<compile_context>
chip_gen: v7x
topology: tpu7x:2x2x1
jax: 0.10.0
libtpu: 0.0.40
codegen_flags: <defaults>
</compile_context>

<pallas_src>
import functools
import math

import jax
import jax.numpy as jnp
from jax import lax
from jax.experimental import pallas as pl
from jax.experimental.pallas import tpu as pltpu


# ----------------------------- in-kernel helpers -----------------------------

def _activation(x):
    # exact (erf-based) GELU, matching torch.nn.GELU() default numerics
    return 0.5 * x * (1.0 + lax.erf(x * (1.0 / math.sqrt(2.0))))


def _row_tile(m):
    """Pick the row-tile: big 8-multiple tile if divisible, else full extent."""
    for t in (256, 128):
        if m >= t and m % t == 0:
            return t
    return m  # full extent is always a legal block size


# ------------------------------- Pallas kernel -------------------------------

def _mlp_block_kernel(x_ref, w_ref, b_ref, o_ref, h_ref):
    # grid = (row_tiles, depth); depth is the trailing "arbitrary" axis.
    # x_ref: (TM, Hp)   w_ref: (1, Hp, Hp)   b_ref: (1, 1, Hp) f32
    # o_ref: (TM, Hp)   h_ref: VMEM scratch (TM, Hp) f32  (activation carry)
    d = pl.program_id(1)

    @pl.when(d == 0)
    def _():
        h_ref[...] = x_ref[...].astype(jnp.float32)

    w = w_ref[0]                                   # (Hp, Hp) weight dtype (bf16)
    h = h_ref[...]                                 # (TM, Hp) f32
    y = jnp.dot(h.astype(w.dtype), w, preferred_element_type=jnp.float32)
    y = y + b_ref[0]                               # (1, Hp) f32 broadcast
    y = _activation(y)
    h_ref[...] = y

    @pl.when(d == pl.num_programs(1) - 1)
    def _():
        o_ref[...] = y.astype(o_ref.dtype)


# ------------------------------ kernel wrapper --------------------------------

def mlp_block_forward(packed, x):
    """Fused MLP block.  x: (..., hidden) -> (..., hidden)."""
    H = packed["hidden"]
    pack = packed["pack"]
    depth = packed["depth"]
    w = packed["w"]                                # (depth, Hp, Hp), (in, out)
    b = packed["b"]                                # (depth, 1, Hp) f32
    Hp = H * pack

    lead = x.shape[:-1]
    M = int(math.prod(lead)) if lead else 1
    x2d = x.reshape(M, H)

    # pad rows so M divides the lane-packing factor, then fold pack rows into lanes
    Mpad = -(-M // pack) * pack
    if Mpad != M:
        x2d = jnp.pad(x2d, ((0, Mpad - M), (0, 0)))
    Mp = Mpad // pack
    xp = x2d.reshape(Mp, Hp)

    tm = _row_tile(Mp)
    grid = (Mp // tm, depth)

    w_bytes = jnp.dtype(w.dtype).itemsize
    x_bytes = jnp.dtype(x.dtype).itemsize
    cost = pl.CostEstimate(
        flops=2 * depth * Mp * Hp * Hp,
        transcendentals=depth * Mp * Hp,
        bytes_accessed=(2 * Mp * Hp * x_bytes
                        + depth * (Hp * Hp * w_bytes + Hp * 4)),
    )

    # VMEM budget: double-buffered x/w/b/out + f32 activation scratch.
    need = (2 * tm * Hp * 4
            + 2 * Hp * Hp * w_bytes
            + 2 * Hp * 4
            + 2 * tm * Hp * x_bytes
            + tm * Hp * 4)
    vmem_limit = int(min(max(2 * need, 16 * 1024 * 1024), 64 * 1024 * 1024))

    out = pl.pallas_call(
        _mlp_block_kernel,
        out_shape=jax.ShapeDtypeStruct((Mp, Hp), x.dtype),
        grid=grid,
        in_specs=[
            pl.BlockSpec((tm, Hp), lambda i, d: (i, 0)),        # x rows
            pl.BlockSpec((1, Hp, Hp), lambda i, d: (d, 0, 0)),  # layer-d weight
            pl.BlockSpec((1, 1, Hp), lambda i, d: (d, 0, 0)),   # layer-d bias
        ],
        out_specs=pl.BlockSpec((tm, Hp), lambda i, d: (i, 0)),
        scratch_shapes=[pltpu.VMEM((tm, Hp), jnp.float32)],
        compiler_params=pltpu.CompilerParams(
            dimension_semantics=("parallel", "arbitrary"),
            vmem_limit_bytes=vmem_limit),
        cost_estimate=cost,
    )(xp, w, b)

    out = out.reshape(Mpad, H)[:M]
    return out.reshape(*lead, H)


# --------------------------------- params --------------------------------------

def init_params(key, hidden: int, depth: int):
    """PyTorch nn.Linear init; weights stored once in (in, out) layout."""
    keys = jax.random.split(key, 2 * depth)
    bound = 1.0 / math.sqrt(hidden)
    ws, bs = [], []
    for d in range(depth):
        w = jax.random.uniform(keys[2 * d], (hidden, hidden), jnp.float32,
                               -bound, bound)           # PyTorch-style (out, in)
        b = jax.random.uniform(keys[2 * d + 1], (hidden,), jnp.float32,
                               -bound, bound)
        ws.append(w.T)                                  # store as (in, out)
        bs.append(b)
    return {"w": jnp.stack(ws), "b": jnp.stack(bs)}     # (D,H,H), (D,H)


def pack_params(params, weight_dtype=jnp.bfloat16, lane_target=128):
    """One-time packing: block-diagonal lane packing (H<128) + bf16 weights."""
    w = params["w"]                                     # (depth, H, H) (in, out)
    b = params["b"]                                     # (depth, H)
    depth, H, _ = w.shape
    pack = max(1, lane_target // H) if H < lane_target else 1
    Hp = pack * H
    if pack > 1:
        eye = jnp.eye(pack, dtype=w.dtype)
        # block-diagonal (depth, pack*H, pack*H): block (p,q) = W if p==q else 0
        wp = jnp.einsum("dij,pq->dpiqj", w, eye).reshape(depth, Hp, Hp)
        bp = jnp.tile(b, (1, pack)).reshape(depth, 1, Hp)
    else:
        wp = w
        bp = b.reshape(depth, 1, H)
    return {"w": wp.astype(weight_dtype),
            "b": bp.astype(jnp.float32),
            "pack": pack, "hidden": H, "depth": depth}


# ------------------------------ pure-JAX reference -----------------------------

def _reference_forward(params, x, weight_dtype=jnp.bfloat16):
    """Same numerics as the kernel: bf16 matmul inputs, f32 accumulate/GELU."""
    w = params["w"].astype(weight_dtype)                # (depth, H, H) (in, out)
    b = params["b"].astype(jnp.float32)                 # (depth, H)
    depth, H, _ = params["w"].shape
    lead = x.shape[:-1]
    h = x.reshape(-1, H).astype(jnp.float32)
    for d in range(depth):
        y = jnp.dot(h.astype(weight_dtype), w[d], preferred_element_type=jnp.float32)
        y = y + b[d][None, :]
        h = _activation(y)
    return h.reshape(*lead, H)


# ---------------------------------- main ---------------------------------------

if __name__ == "__main__":
    # Shapes consistent with the module: hidden_size=32, depth=4,
    # input (batch=2, seq=8, hidden=32).
    hidden = 32
    depth = 4
    batch, seq = 2, 8

    key = jax.random.PRNGKey(0)
    pkey, xkey = jax.random.split(key)
    params = init_params(pkey, hidden, depth)
    packed = pack_params(params, weight_dtype=jnp.bfloat16)
    x = jax.random.normal(xkey, (batch, seq, hidden), jnp.float32)

    y = mlp_block_forward(packed, x)
    jax.block_until_ready(y)

    assert y.shape == (batch, seq, hidden), y.shape

    y_ref = _reference_forward(params, x, weight_dtype=jnp.bfloat16)
    assert jnp.allclose(y, y_ref, rtol=1e-2, atol=1e-2), (
        float(jnp.max(jnp.abs(y - y_ref))))

    print("KERNEL_OK")
</pallas_src>

<mosaic_0001>
module attributes {stable_mosaic.version = 11 : i64} {
  func.func @_mlp_block_kernel(%arg0: i32, %arg1: i32, %arg2: memref<4x128xf32, #tpu.memory_space<vmem>>, %arg3: memref<1x128x128xbf16, #tpu.memory_space<vmem>>, %arg4: memref<1x1x128xf32, #tpu.memory_space<vmem>>, %arg5: memref<4x128xf32, #tpu.memory_space<vmem>>, %arg6: memref<4x128xf32, #tpu.memory_space<vmem>>) attributes {dimension_semantics = [#tpu.dimension_semantics<parallel>, #tpu.dimension_semantics<arbitrary>], iteration_bounds = array<i64: 1, 4>, scalar_prefetch = 0 : i64, scratch_operands = 1 : i64, tpu.core_type = #tpu.core_type<tc>, window_params = [{transform_indices = @transform_0, window_bounds = array<i64: 4, 128>}, {transform_indices = @transform_1, window_bounds = array<i64: 1, 128, 128>}, {transform_indices = @transform_2, window_bounds = array<i64: 1, 1, 128>}, {transform_indices = @transform_3, window_bounds = array<i64: 4, 128>}]} {
    %c0_i32 = arith.constant 0 : i32
    %0 = arith.cmpi eq, %arg1, %c0_i32 : i32
    %1 = arith.extui %0 : i1 to i32
    %c0_i32_0 = arith.constant 0 : i32
    %2 = arith.cmpi ne, %1, %c0_i32_0 : i32
    scf.if %2 {
      %c0_14 = arith.constant 0 : index
      %c0_15 = arith.constant 0 : index
      %24 = vector.load %arg2[%c0_14, %c0_15] : memref<4x128xf32, #tpu.memory_space<vmem>>, vector<4x128xf32>
      %c0_16 = arith.constant 0 : index
      %c0_17 = arith.constant 0 : index
      %25 = vector.load %arg6[%c0_16, %c0_17] : memref<4x128xf32, #tpu.memory_space<vmem>>, vector<4x128xf32>
      tpu.vector_store %arg6[%c0_16, %c0_17], %24 {strides = array<i32>} : memref<4x128xf32, #tpu.memory_space<vmem>>, vector<4x128xf32>,
    } else {
    }
    %c0 = arith.constant 0 : index
    %c0_1 = arith.constant 0 : index
    %c0_2 = arith.constant 0 : index
    %3 = vector.load %arg3[%c0, %c0_1, %c0_2] : memref<1x128x128xbf16, #tpu.memory_space<vmem>>, vector<1x128x128xbf16>
    %4 = vector.shape_cast %3 : vector<1x128x128xbf16> to vector<128x128xbf16>
    %c0_3 = arith.constant 0 : index
    %c0_4 = arith.constant 0 : index
    %5 = vector.load %arg6[%c0_3, %c0_4] : memref<4x128xf32, #tpu.memory_space<vmem>>, vector<4x128xf32>
    %6 = arith.truncf %5 : vector<4x128xf32> to vector<4x128xbf16>
    %cst = arith.constant dense<0.000000e+00> : vector<4x128xf32>
    %7 = tpu.matmul %6, %4, %cst {dimension_numbers = #tpu.dot_dimension_numbers<[1], [0], [0], [1], [0, 0, 1, 1], [], []>} : vector<4x128xbf16>, vector<128x128xbf16>, vector<4x128xf32> -> vector<4x128xf32>
    %c0_5 = arith.constant 0 : index
    %c0_6 = arith.constant 0 : index
    %c0_7 = arith.constant 0 : index
    %8 = vector.load %arg4[%c0_5, %c0_6, %c0_7] : memref<1x1x128xf32, #tpu.memory_space<vmem>>, vector<1x1x128xf32>
    %9 = vector.shape_cast %8 : vector<1x1x128xf32> to vector<1x128xf32>
    %10 = vector.broadcast %9 : vector<1x128xf32> to vector<4x128xf32>
    %11 = arith.addf %7, %10 : vector<4x128xf32>
    %cst_8 = arith.constant 5.000000e-01 : f32
    %12 = vector.broadcast %cst_8 : f32 to vector<4x128xf32>
    %13 = arith.mulf %12, %11 : vector<4x128xf32>
    %cst_9 = arith.constant 0.707106769 : f32
    %14 = vector.broadcast %cst_9 : f32 to vector<4x128xf32>
    %15 = arith.mulf %11, %14 : vector<4x128xf32>
    %16 = math.erf %15 : vector<4x128xf32>
    %cst_10 = arith.constant 1.000000e+00 : f32
    %17 = vector.broadcast %cst_10 : f32 to vector<4x128xf32>
    %18 = arith.addf %17, %16 : vector<4x128xf32>
    %19 = arith.mulf %13, %18 : vector<4x128xf32>
    %c0_11 = arith.constant 0 : index
    %c0_12 = arith.constant 0 : index
    %20 = vector.load %arg6[%c0_11, %c0_12] : memref<4x128xf32, #tpu.memory_space<vmem>>, vector<4x128xf32>
    tpu.vector_store %arg6[%c0_11, %c0_12], %19 {strides = array<i32>} : memref<4x128xf32, #tpu.memory_space<vmem>>, vector<4x128xf32>,
    %c3_i32 = arith.constant 3 : i32
    %21 = arith.cmpi eq, %arg1, %c3_i32 : i32
    %22 = arith.extui %21 : i1 to i32
    %c0_i32_13 = arith.constant 0 : i32
    %23 = arith.cmpi ne, %22, %c0_i32_13 : i32
    scf.if %23 {
      %c0_14 = arith.constant 0 : index
      %c0_15 = arith.constant 0 : index
      %24 = vector.load %arg5[%c0_14, %c0_15] : memref<4x128xf32, #tpu.memory_space<vmem>>, vector<4x128xf32>
      tpu.vector_store %arg5[%c0_14, %c0_15], %19 {strides = array<i32>} : memref<4x128xf32, #tpu.memory_space<vmem>>, vector<4x128xf32>,
    } else {
    }
    return
  }
  func.func @transform_0(%arg0: i32, %arg1: i32) -> (i32, i32) {
    %c0_i32 = arith.constant 0 : i32
    %c0_i32_0 = arith.constant 0 : i32
    return %arg0, %c0_i32 : i32, i32
  }
  func.func @transform_1(%arg0: i32, %arg1: i32) -> (i32, i32, i32) {
    %c0_i32 = arith.constant 0 : i32
    %c0_i32_0 = arith.constant 0 : i32
    %c0_i32_1 = arith.constant 0 : i32
    return %arg1, %c0_i32, %c0_i32_0 : i32, i32, i32
  }
  func.func @transform_2(%arg0: i32, %arg1: i32) -> (i32, i32, i32) {
    %c0_i32 = arith.constant 0 : i32
    %c0_i32_0 = arith.constant 0 : i32
    %c0_i32_1 = arith.constant 0 : i32
    return %arg1, %c0_i32, %c0_i32_0 : i32, i32, i32
  }
  func.func @transform_3(%arg0: i32, %arg1: i32) -> (i32, i32) {
    %c0_i32 = arith.constant 0 : i32
    %c0_i32_0 = arith.constant 0 : i32
    return %arg0, %c0_i32 : i32, i32
  }
}

</mosaic_0001>

<bundles_post_ra>
// kernel: tpu_custom_call.1
= control target key start
LH: loop header
LB: loop body
LE: loop exit
PB: predicated region body
PF: predicated region fallthrough
CT: control target
= control target key end

     0   :  { %8 = vsyncpa [#allocation4], 0  ;;  %s985_s0 = inlined_call_operand.hbm [shape: f32[4,128], index: 0, kind: input, shape index: {}]   ;;  %s986_s1 = inlined_call_operand.hbm [shape: bf16[4,128,128], index: 1, kind: input, shape index: {}]   ;;  %s987_s2 = inlined_call_operand.vmem [shape: f32[4,1,128], index: 2, kind: input, shape index: {}]   ;;  %s988_s3 = inlined_call_operand.hbm [shape: f32[4,128], index: 3, kind: output, shape index: {}]  }
   0x1   :  { %9 = vsyncpa [#allocation7], 0 }
   0x2   :  { %11 = vsyncpa [#allocation7 + $0x1], 0 }
   0x3   :  { %12 = vsyncpa [#allocation5], 0  ;;  %s765_s12 = smov 0   ;;  %s767_s13 = smov 0  }
   0x4   :  { %s769_s14 = smov 0   ;;  %s771_s15 = smov 0  }
   0x5   :  { %s773_s16 = smov 0   ;;  %s775_s17 = smov 0  }
   0x6 LB: > { %s452_s18 = sadd.s32 4294967295, %s736_s17   ;;  %s63_s19 = sadd.s32 1, %s724_s14  ;;  %s736_s17 = sphi %s775_s17, %s18_s17   ;;  %s732_s16 = sphi %s773_s16, %s1009_s16   ;;  %s728_s15 = sphi %s771_s15, %s1008_s15   ;;  %s724_s14 = sphi %s769_s14, %s1007_s14   ;;  %s720_s13 = sphi %s767_s13, %s1006_s13   ;;  %s716_s12 = sphi %s765_s12, %s1005_s12  }
   0x7   : > { %p70_p0 = scmp.ne.s32.totalorder %s724_s14, %s720_s13  ;;  %p71_p1 = scmp.eq.s32.totalorder %s736_s17, 0 }
   0x8   : > { %p76_p2 = scmp.ne.s32.totalorder %s720_s13, %s716_s12  ;;  %p801_p3 = scmp.eq.s32.totalorder %s452_s18, 0 }
   0x9   : > { %p72_p4 = por %p71_p1, %p70_p0  ;;  %p453_p5 = scmp.ge.s32.totalorder %s736_s17, 1 }
   0xa   : > { %s994_s20 = scalar_select %p801_p3, 1, 0 }
   0xb   : > { %p808_p6 = por %p801_p3, %p76_p2  ;;  %p139_p7 = scmp.lt.s32.totalorder %s736_s17, 5 }
   0xc   : > { %s738_s23 = smov [#allocation3]   ;;  %p526_p10 = scmp.lt.s32.totalorder %s736_s17, 4 }
   0xd   : > { %s995_s21 = scalar_select %p808_p6, 1, 0 }
   0xe   : > { %p813_p8 = pnand %p453_p5, %p139_p7  ;;  %s154_s24 = sshll.u32 %s738_s23, 4  ;;  %s155_s24 = int_to_ptr.vmem [resolvable:$true] %s154_s24 }
   0xf   : > { %s165_s25 = sand.u32 1, %s724_s14   ;;  %p827_p12 = pnand %p526_p10, %p72_p4 }
  0x10   : > { %s996_s22 = scalar_select %p813_p8, 1, 0 }
  0x11   : > { %p517_p9 = pneg %p813_p8  ;;  %s594_s30 = scalar_lea.hbm %s985_s0, 64 }
  0x12   : > { %s998_s27 = scalar_select %p827_p12, 1, 0 }
  0x13   : > { %p823_p11 = pnand %p517_p9, %p801_p3  ;;  %p595_p13 = scmp.ne.s32.totalorder %s985_s0, %s594_s30 }
  0x14   : > { %p601_p5 = scmp.lt.u32.totalorder %s594_s30, %s985_s0 }
  0x15   : > { %p596_p0 = pneg %p823_p11 }
  0x17   : > { %p597_p1 = pnand %p596_p0, %p595_p13 }
  0x19   : > { %p598_p2 = pneg %p597_p1 }
  0x1b   : > { %p603_p4 = pnand %p601_p5, %p598_p2 }
  0x1d   : > { %606 = shalt.err (!%p603_p4)
}
  0x1e   : > { %s607_s8 = scalar_lea.vmem %s155_s24, 64  ;;  %p615_p6 = scmp.lt.s32.totalorder %s155_s24, %s155_s24 }
  0x1f   : > { %p608_p7 = scmp.ne.s32.totalorder %s155_s24, %s607_s8  ;;  %p616_p3 = scmp.lt.s32.totalorder %s607_s8, %s607_s8 }
  0x21   : > { %p610_p9 = pnand %p608_p7, %p596_p0  ;;  %p617_p8 = por %p616_p3, %p615_p6 }
  0x23   : > { %p611_p10 = pneg %p610_p9 }
  0x25   : > { %p618_p12 = pnand %p617_p8, %p611_p10 }
  0x27   : > { %621 = shalt.err (!%p618_p12)
}
  0x28   : > { %520 = dma.hbm_to_vmem [thread:$0]  (!%p823_p11), %s985_s0, 64, %s155_s24, [#allocation4]  }
  0x29   : > { %s27_s11 = sadd.s32 1, %s732_s16  ;;  %s456_s12 = sshll.u32 %s165_s25, 6 }
  0x2a   : > { %p28_p13 = scmp.ge.s32.totalorder %s27_s11, 4  ;;  %s477_s23 = sshll.u32 %s732_s16, 10 }
  0x2b   : > { %s169_s28 = scalar_lea.vmem [#allocation6], %s456_s12  ;;  %s856_s4 = scalar_lea.hbm %s986_s1, %s477_s23 }
  0x2c   : > { %s176_s29 = sshll.u32 %s169_s28, 4  ;;  %s1011_s11 = smov (%p28_p13, %s27_s11), 0  ;;  %s858_s29 = int_to_ptr.vmem [resolvable:$true] %s176_s29 }
  0x2d   : > { %s60_s24 = ssub.s32 %s732_s16, %s1011_s11  ;;  %s868_s6 = scalar_lea.sflag [#allocation7], %s165_s25 }
  0x2e   : > { %p862_p3 = scmp.eq.s32.totalorder %s60_s24, 0  ;;  %s622_s7 = scalar_lea.hbm %s856_s4, 1024 }
  0x2f   : > { %p623_p6 = scmp.ne.s32.totalorder %s856_s4, %s622_s7  ;;  %p1000_p8 = scmp.ne.s32.totalorder %s998_s27, 0 }
  0x30   : > { %s627_s10 = scalar_lea.hbm %s986_s1, 4096  ;;  %p628_p1 = scmp.lt.u32.totalorder %s856_s4, %s986_s1 }
  0x31   : > { %p624_p11 = pneg %p1000_p8  ;;  %p629_p2 = scmp.lt.u32.totalorder %s627_s10, %s622_s7 }
  0x32   : > { %p631_p4 = scmp.lt.u32.totalorder %s622_s7, %s856_s4 }
  0x33   : > { %p625_p12 = pnand %p624_p11, %p623_p6  ;;  %p630_p5 = por %p629_p2, %p628_p1 }
  0x35   : > { %p626_p0 = pneg %p625_p12  ;;  %p632_p7 = por %p631_p4, %p630_p5 }
  0x37   : > { %p633_p9 = pnand %p632_p7, %p626_p0 }
  0x39   : > { %636 = shalt.err (!%p633_p9)
}
  0x3a   : > { %s637_s25 = scalar_lea.vmem %s858_s29, 1024  ;;  %s739_s28 = smov [#allocation6]  }
  0x3b   : > { %p638_p10 = scmp.ne.s32.totalorder %s858_s29, %s637_s25  ;;  %s642_s26 = sshll.u32 %s739_s28, 4  ;;  %s643_s26 = int_to_ptr.vmem [resolvable:$false] %s642_s26 }
  0x3c   : > { %s644_s30 = scalar_lea.vmem %s643_s26, 2048  ;;  %p645_p12 = scmp.lt.s32.totalorder %s858_s29, %s643_s26 }
  0x3d   : > { %p640_p13 = pnand %p638_p10, %p624_p11  ;;  %p646_p1 = scmp.lt.s32.totalorder %s644_s30, %s637_s25 }
  0x3f   : > { %p641_p6 = pneg %p640_p13  ;;  %p647_p2 = por %p646_p1, %p645_p12 }
  0x41   : > { %p648_p5 = pnand %p647_p2, %p641_p6 }
  0x43   : > { %651 = shalt.err (!%p648_p5)
}
  0x44   : > { %s740_s24 = smov 64   ;;  %s741_s7 = smov 4  }
  0x45   : > { %524 = dma.hbm_to_vmem [thread:$0]  (!%p1000_p8), %s856_s4, 1024, %s858_s29, %s868_s6, %s740_s24, %s740_s24, %s741_s7  }
  0x46   : > { %s901_s8 = scalar_select %p862_p3, %s724_s14, %s63_s19  }
  0x47   : > { %p1001_p11 = scmp.ne.s32.totalorder %s996_s22, 0 }
  0x48   : > { %p1002_p0 = scmp.ne.s32.totalorder (!%p1001_p11), %s994_s20, 0 }
  0x49   : > { %194 = sbr.rel (%p1001_p11) target bundleno = 385 (0x181), region = 32 }
  0x50   : > { %703 = dma.done.wait (%p1002_p0), [#allocation4], 64  }
  0x51   : > { %705 = vsyncadd (%p1002_p0), [#allocation4], 4294967232  ;;  %s200_s9 = sand.u32 1, %s720_s13   ;;  %p1003_p8 = scmp.ne.s32.totalorder %s995_s21, 0 }
  0x52   : > { %s461_s10 = sshll.u32 %s200_s9, 6  ;;  %s201_s12 = scalar_lea.sflag [#allocation7], %s200_s9 }
  0x53   : > { %s910_s27 = scalar_lea.vmem [#allocation6], %s461_s10 }
  0x54   : > { %707 = dma.done.wait (%p1003_p8), %s201_s12, 1024  }
  0x55   : > { %709 = vsyncadd (%p1003_p8), %s201_s12, 4294966272  ;;  %p225_p3 = scmp.lt.s32.totalorder %s728_s15, 3  ;;  %p462_p4 = scmp.ne.s32.totalorder %s728_s15, 0 }
  0x56   : > { %v233_v0 = vld [vmem:[#allocation3] sm:$0xf] (!%p462_p4) }
  0x57   : > { %s918_s19 = scalar_select %p225_p3, %s728_s15, 3 }
  0x58   : > { %232 = sbr.rel (%p462_p4) target bundleno = 95 (0x5f), region = 44  ;;  %234 = vst [vmem:[#allocation2] sm:$0xf] (!%p462_p4), %v233_v0 }
  0x59   : > { %s227_s29 = scalar_lea.vmem %s987_s2, %s918_s19 }
  0x5f PF: > { %v584_v1 = vld [vmem:[%s910_s27] sm:$0xff]   ;;  %v742_v2 = vmov 0.0   ;;  %v585_v3 = vld [vmem:[%s910_s27 + $0x8] sm:$0xff]   ;;  %vm743_vm0 = vmmov 0   ;;  %v586_v4 = vld [vmem:[%s910_s27 + $0x10] sm:$0xff]   ;;  %p472_p7 = scmp.ne.s32.totalorder %s728_s15, 3 }
  0x60   : > { %487 = vmatprep.subr.bf16.mxu0 %v742_v2  ;;  %503 = vmatprep.mubr.msk.bf16.mxu0 %vm743_vm0, %v742_v2  ;;  %v587_v5 = vld [vmem:[%s910_s27 + $0x18] sm:$0xff]   ;;  %v588_v6 = vld [vmem:[%s910_s27 + $0x20] sm:$0xff]   ;;  %v589_v7 = vld [vmem:[%s910_s27 + $0x28] sm:$0xff]  }
  0x61   : > { %488 = vmatpush3.bf16.msra.mxu0 %v584_v1  ;;  %v590_v8 = vld [vmem:[%s910_s27 + $0x30] sm:$0xff]   ;;  %v591_v9 = vld [vmem:[%s910_s27 + $0x38] sm:$0xff]  }
  0x62   : > { %489 = vmatprep.subr.bf16.mxu0 %v742_v2  ;;  %v251_v10 = vld [vmem:[#allocation2] sm:$0xf] }
  0x63   : > { %v252_v11 = vpack.c.bf16 %v251_v10, %v251_v10  ;;  %v463_v12 = vld [vmem:[%s227_s29] ss:$0 sm:$0xff] }
  0x65   : > { %490 = vmatpush3.bf16.msra.mxu0 %v585_v3 }
  0x66   : > { %491 = vmatprep.subr.bf16.mxu0 %v742_v2 }
  0x69   : > { %492 = vmatpush3.bf16.msra.mxu0 %v586_v4 }
  0x6a   : > { %493 = vmatprep.subr.bf16.mxu0 %v742_v2 }
  0x6d   : > { %494 = vmatpush3.bf16.msra.mxu0 %v587_v5 }
  0x6e   : > { %495 = vmatprep.subr.bf16.mxu0 %v742_v2 }
  0x71   : > { %496 = vmatpush3.bf16.msra.mxu0 %v588_v6 }
  0x72   : > { %497 = vmatprep.subr.bf16.mxu0 %v742_v2 }
  0x75   : > { %498 = vmatpush3.bf16.msra.mxu0 %v589_v7 }
  0x76   : > { %499 = vmatprep.subr.bf16.mxu0 %v742_v2 }
  0x79   : > { %500 = vmatpush3.bf16.msra.mxu0 %v590_v8 }
  0x7a   : > { %501 = vmatprep.subr.bf16.mxu0 %v742_v2 }
  0x7d   : > { %502 = vmatpush3.bf16.msra.mxu0 %v591_v9 }
  0x80   : > { %504 = vmatmul.mubr.bf16.vlgmr.msra.gmra.mrb[0].mxu0 %v252_v11 }
 0x153   : > { %v342_v13 = vpop.f32.mrb[0].mxu0 }
 0x154   : > { %v343_v14 = vadd.f32 %v463_v12, %v342_v13  ;;  %v505_v15 = vpop.f32.mrb[1].mxu0 }
 0x155   : > { %v345_v16 = vpop.f32.mrb[2].mxu0 }
 0x156   : > { %v349_v17 = vmul.f32 0.70710677, %v343_v14  ;;  %v506_v18 = vpop.f32.mrb[3].mxu0  ;;  %v348_v20 = vmul.f32 0.5, %v343_v14 }
 0x158   : > { %592 = verf.f32 %v349_v17 }
 0x161   : > { %357 = sbr.rel (%p472_p7) target bundleno = 360 (0x168), region = 48 }
 0x162   : > { %v593_v19 = vpop.eup %592 }
 0x163   : > { %v351_v21 = vadd.f32 1.0, %v593_v19 }
 0x165   : > { %v352_v22 = vmul.f32 %v351_v21, %v348_v20 }
 0x167   : > { %353 = vst [vmem:[#allocation2] sm:$0xf] %v352_v22  ;;  %358 = vst [vmem:[#allocation8] sm:$0xf] (!%p472_p7), %v352_v22 }
 0x168 PF: > { %p941_p9 = scmp.eq.s32.totalorder %s452_s18, 3  ;;  %s744_s6 = smov [#allocation8]  }
 0x169   : > { %s368_s23 = sshll.u32 %s744_s6, 4  ;;  %s369_s23 = int_to_ptr.vmem [resolvable:$true] %s368_s23 }
 0x16a   : > { %s652_s25 = scalar_lea.vmem %s369_s23, 64  ;;  %p659_p12 = scmp.lt.s32.totalorder %s369_s23, %s369_s23 }
 0x16b   : > { %p653_p10 = scmp.ne.s32.totalorder %s369_s23, %s652_s25  ;;  %p660_p1 = scmp.lt.s32.totalorder %s652_s25, %s652_s25 }
 0x16d   : > { %p654_p13 = pnand %p653_p10, %p941_p9  ;;  %p661_p2 = por %p660_p1, %p659_p12 }
 0x16f   : > { %p655_p6 = pneg %p654_p13 }
 0x171   : > { %p662_p5 = pnand %p661_p2, %p655_p6 }
 0x173   : > { %665 = shalt.err (!%p662_p5)
}
 0x174   : > { %s666_s18 = scalar_lea.hbm %s988_s3, 64 }
 0x175   : > { %p667_p11 = scmp.ne.s32.totalorder %s988_s3, %s666_s18  ;;  %p672_p3 = scmp.lt.u32.totalorder %s666_s18, %s988_s3 }
 0x177   : > { %p668_p0 = pnand %p667_p11, %p941_p9 }
 0x179   : > { %p669_p8 = pneg %p668_p0 }
 0x17b   : > { %p674_p4 = pnand %p672_p3, %p669_p8 }
 0x17d   : > { %677 = shalt.err (!%p674_p4)
}
 0x17e   : > { %514 = dma.vmem_to_hbm [thread:$0]  (%p941_p9), %s369_s23, 64, %s988_s3, [#allocation5]  }
 0x17f   : > { %711 = dma.done.wait (%p941_p9), [#allocation5], 64  }
 0x180   : > { %713 = vsyncadd (%p941_p9), [#allocation5], 4294967232 }
 0x181 PF: > { %s18_s17 = sadd.s32 1, %s736_s17   ;;  %s1005_s12 = smov %s720_s13 }
 0x182   : > { %p15_p7 = scmp.ge.s32.totalorder %s18_s17, 6   ;;  %s1006_s13 = smov %s724_s14 }
 0x183   : > { %s1007_s14 = smov %s901_s8  ;;  %s1008_s15 = smov %s732_s16 }
 0x184   : > { %s1009_s16 = smov %s1011_s11  ;;  %17 = sbr.rel (!%p15_p7) target bundleno = 6 (0x6), region = 87 }
 0x18b   :  { %381 = vsyncpa [#allocation4], 1 }
 0x18c   :  { %383 = vsyncpa [#allocation4 + $0x1], 1 }
 0x18d   :  { %384 = vsyncpa [#allocation7], 1 }
 0x18e   :  { %386 = vsyncpa [#allocation7 + $0x1], 1 }
 0x18f   :  { %387 = vsyncpa [#allocation5], 1 }
 0x190   :  { %389 = vsyncpa [#allocation5 + $0x1], 1 }

</bundles_post_ra>
